<compile_context>
chip_gen: v5e
topology: v5e:2x2
jax: 0.10.0
libtpu: 0.0.40
codegen_flags: <defaults>
</compile_context>

<pallas_src>
import math
import functools

import jax
import jax.numpy as jnp
from jax import lax
from jax.experimental import pallas as pl
from jax.experimental.pallas import tpu as pltpu


def _round_up(x, m):
    return ((x + m - 1) // m) * m


_VMEM_FALLBACK_BYTES = 64 * 1024 * 1024   # v7x per-TensorCore VMEM (most restrictive)


def _vmem_capacity_bytes():
    try:
        return int(pltpu.get_tpu_info().vmem_capacity_bytes)
    except Exception:                      # interpret mode / older runtimes
        return _VMEM_FALLBACK_BYTES


# ---------------------------------------------------------------------------
# Kernel 1: in-kernel Kronecker expansion + rank reduction + LayerNorm
# ---------------------------------------------------------------------------
def _emb_matrix_kernel(*refs, order, rank, rank_chunk, eps, e_real):
    # refs layout:
    #   [0:order]        core_i   (rank, tile_s, cd)   bf16
    #   [order:2*order]  P_i      (cd, E_pad)          bf16 (exact 0/1)
    #   [2*order]        ln_w     (1, E_pad)           f32
    #   [2*order+1]      ln_b     (1, E_pad)           f32
    #   [2*order+2]      out      (tile_s, E_pad)      matrix_dtype
    #   [2*order+3]      acc      (tile_s, E_pad)      f32 VMEM scratch
    core_refs = refs[:order]
    p_refs = refs[order:2 * order]
    ln_w_ref = refs[2 * order]
    ln_b_ref = refs[2 * order + 1]
    out_ref = refs[2 * order + 2]
    acc_ref = refs[2 * order + 3]

    tile_s, e_pad = out_ref.shape
    cd = p_refs[0].shape[0]

    # Rank-fused expansion: per order factor one (rc*tile_s, cd) @ (cd, E_pad)
    # MXU push (amortizes fill/drain over the whole rank chunk), elementwise
    # product across order factors on the VPU, rank-sum into the VMEM scratch.
    r0 = 0
    first = True
    while r0 < rank:                       # static Python loop, rank is small
        rc = min(rank_chunk, rank - r0)
        prod = None
        for i in range(order):
            blk = core_refs[i][pl.ds(r0, rc)]                    # (rc, tile_s, cd)
            blk2 = blk.reshape(rc * tile_s, cd)
            exp_i = jnp.dot(blk2, p_refs[i][...],
                            preferred_element_type=jnp.float32)  # (rc*tile_s, E_pad)
            prod = exp_i if prod is None else prod * exp_i
        part = prod[0:tile_s]
        for rr in range(1, rc):                                  # rank-sum (VPU)
            part = part + prod[rr * tile_s:(rr + 1) * tile_s]
        if first:
            acc_ref[...] = part
            first = False
        else:
            acc_ref[...] += part
        r0 += rc

    # Two-pass LayerNorm over the real embedding_dim. Padded lanes of acc are
    # exactly 0 (the expansion matrices have zero-padded columns); they are
    # masked out of the centered variance, and the zero-padded ln_w/ln_b make
    # the padded output lanes exactly 0.
    acc = acc_ref[...]
    inv_e = 1.0 / float(e_real)
    mean = jnp.sum(acc, axis=-1, keepdims=True) * inv_e
    lane = lax.broadcasted_iota(jnp.int32, acc.shape, 1)
    centered = jnp.where(lane < e_real, acc - mean, 0.0)
    var = jnp.sum(centered * centered, axis=-1, keepdims=True) * inv_e
    normed = centered * lax.rsqrt(var + eps)
    out_ref[...] = (normed * ln_w_ref[...] + ln_b_ref[...]).astype(out_ref.dtype)


# ---------------------------------------------------------------------------
# Kernel 2a: one-hot MXU lookup (matrix VMEM-resident), chunked over surfaces
# ---------------------------------------------------------------------------
def _lookup_onehot_kernel(ids_ref, word_ref, out_ref, acc_ref, *, s_chunk):
    ids = ids_ref[...]                              # (tile_tok, 1) int32
    tile_tok = ids.shape[0]
    s_pad = word_ref.shape[0]
    n_chunks = s_pad // s_chunk                     # exact by construction

    def chunk_dot(base):
        rows = word_ref[pl.ds(base, s_chunk), :]    # (s_chunk, E_pad)
        iota = lax.broadcasted_iota(jnp.int32, (tile_tok, s_chunk), 1) + base
        onehot = (ids == iota).astype(rows.dtype)   # padded ids pick row 0 (sliced off)
        return jnp.dot(onehot, rows, preferred_element_type=jnp.float32)

    if n_chunks == 1:
        out_ref[...] = chunk_dot(0).astype(out_ref.dtype)
    else:
        acc_ref[...] = jnp.zeros_like(acc_ref)

        def body(c, carry):
            base = pl.multiple_of(c * s_chunk, s_chunk)
            acc_ref[...] += chunk_dot(base)
            return carry

        lax.fori_loop(0, n_chunks, body, 0)
        out_ref[...] = acc_ref[...].astype(out_ref.dtype)


# ---------------------------------------------------------------------------
# Kernel 2b: row-gather lookup for large vocabularies (matrix streamed by row)
# ---------------------------------------------------------------------------
def _lookup_gather_kernel(ids_ref, row_ref, out_ref):
    # ids_ref (SMEM, scalar-prefetched) is consumed by the index_map only.
    del ids_ref
    out_ref[...] = row_ref[...].astype(out_ref.dtype)


# ---------------------------------------------------------------------------
# Wrapper
# ---------------------------------------------------------------------------
def morphte_embedding_forward(token_ids, weight, co_matrix, ln_weight, ln_bias,
                              embedding_dim, *, order=3, eps=1e-5,
                              tile_s=128, tile_tok=256,
                              matrix_dtype=jnp.bfloat16,
                              core_dtype=jnp.bfloat16,
                              out_dtype=jnp.bfloat16,
                              force_gather=None):
    rank, num_embeddings, cd = weight.shape
    num_surfaces = co_matrix.shape[0]
    E = int(embedding_dim)
    assert cd ** order >= E, "core_dim**order must cover embedding_dim"

    e_pad = _round_up(E, 128)                       # lane-dense output slab

    vmem_cap = _vmem_capacity_bytes()               # v5e/v6e: 128 MiB, v7x: 64 MiB/TC
    vmem_limit = max(32 * 1024 * 1024, min(int(0.8 * vmem_cap), 112 * 1024 * 1024))

    # ---- glue: gather per-surface core rows; small (rank, S, cd) tensors, bf16.
    cores = [weight[:, co_matrix[:, i], :].astype(core_dtype) for i in range(order)]

    # ---- static 0/1 expansion matrices: expanded_i[:, j] = core_i[:, idx_i[j]]
    j = jnp.arange(E)
    a = jnp.arange(cd)
    p_mats = []
    for i in range(order):
        idx_i = (j // (cd ** (order - 1 - i))) % cd               # (E,)
        p = (a[:, None] == idx_i[None, :]).astype(core_dtype)     # exact in bf16
        p_mats.append(jnp.pad(p, ((0, 0), (0, e_pad - E))))

    ln_w2 = jnp.pad(ln_weight.astype(jnp.float32).reshape(1, E), ((0, 0), (0, e_pad - E)))
    ln_b2 = jnp.pad(ln_bias.astype(jnp.float32).reshape(1, E), ((0, 0), (0, e_pad - E)))

    # ---- surface tiling (16-aligned so bf16 sublane packing stays tile-aligned)
    tile_s_eff = min(tile_s, _round_up(num_surfaces, 16))
    s_pad = _round_up(num_surfaces, tile_s_eff)
    if s_pad != num_surfaces:
        cores = [jnp.pad(c, ((0, 0), (0, s_pad - num_surfaces), (0, 0))) for c in cores]
    grid_s = s_pad // tile_s_eff
    # rank chunk so each fused dot has M = rank_chunk * tile_s <= ~512 rows
    rank_chunk = max(1, min(rank, 512 // tile_s_eff))

    core_spec = pl.BlockSpec((rank, tile_s_eff, cd), lambda i: (0, i, 0))
    p_spec = pl.BlockSpec((cd, e_pad), lambda i: (0, 0), pipeline_mode=pl.Buffered(1))
    ln_spec = pl.BlockSpec((1, e_pad), lambda i: (0, 0), pipeline_mode=pl.Buffered(1))

    emb_matrix = pl.pallas_call(
        functools.partial(_emb_matrix_kernel, order=order, rank=rank,
                          rank_chunk=rank_chunk, eps=eps, e_real=E),
        out_shape=jax.ShapeDtypeStruct((s_pad, e_pad), matrix_dtype),
        grid_spec=pltpu.PrefetchScalarGridSpec(
            num_scalar_prefetch=0,
            grid=(grid_s,),
            in_specs=[core_spec] * order + [p_spec] * order + [ln_spec, ln_spec],
            out_specs=pl.BlockSpec((tile_s_eff, e_pad), lambda i: (i, 0)),
            scratch_shapes=[pltpu.VMEM((tile_s_eff, e_pad), jnp.float32)],
        ),
        compiler_params=pltpu.CompilerParams(
            dimension_semantics=("parallel",),
            vmem_limit_bytes=vmem_limit),
    )(*cores, *p_mats, ln_w2, ln_b2)

    # ---- lookup
    bs, seq_len = token_ids.shape
    flat_ids = token_ids.reshape(-1).astype(jnp.int32)
    n_tok = flat_ids.shape[0]

    matrix_bytes = s_pad * e_pad * jnp.dtype(matrix_dtype).itemsize
    if force_gather is None:
        # Keep the matrix VMEM-resident only while it is comfortably below the
        # per-core VMEM capacity (it is single-buffered via Buffered(1)).
        use_gather = matrix_bytes > int(0.35 * vmem_cap)
    else:
        use_gather = bool(force_gather)

    if use_gather:
        # Large-vocab path: O(n_tok * E) bytes of row DMA, matrix never resident.
        # Scalar-prefetched ids drive a data-dependent index_map; the
        # (s_pad, 1, e_pad) view keeps every block's last two dims == full dims.
        ids_g = jnp.clip(flat_ids, 0, num_surfaces - 1)   # torch would error on OOB ids
        word3 = emb_matrix.reshape(s_pad, 1, e_pad)
        out3 = pl.pallas_call(
            _lookup_gather_kernel,
            out_shape=jax.ShapeDtypeStruct((n_tok, 1, e_pad), out_dtype),
            grid_spec=pltpu.PrefetchScalarGridSpec(
                num_scalar_prefetch=1,
                grid=(n_tok,),
                in_specs=[pl.BlockSpec((1, 1, e_pad), lambda t, ids: (ids[t], 0, 0))],
                out_specs=pl.BlockSpec((1, 1, e_pad), lambda t, ids: (t, 0, 0)),
            ),
            compiler_params=pltpu.CompilerParams(
                dimension_semantics=("arbitrary",),
                vmem_limit_bytes=vmem_limit),
        )(ids_g, word3)
        out_flat = out3.reshape(n_tok, e_pad)
    else:
        tile_tok_eff = min(tile_tok, _round_up(n_tok, 16))
        t_pad = _round_up(n_tok, tile_tok_eff)
        ids2 = jnp.pad(flat_ids, (0, t_pad - n_tok)).reshape(t_pad, 1)
        grid_t = t_pad // tile_tok_eff
        s_chunk = s_pad if s_pad <= 1024 else tile_s_eff      # divides s_pad exactly

        out_pad = pl.pallas_call(
            functools.partial(_lookup_onehot_kernel, s_chunk=s_chunk),
            out_shape=jax.ShapeDtypeStruct((t_pad, e_pad), out_dtype),
            grid_spec=pltpu.PrefetchScalarGridSpec(
                num_scalar_prefetch=0,
                grid=(grid_t,),
                in_specs=[pl.BlockSpec((tile_tok_eff, 1), lambda t: (t, 0)),
                          pl.BlockSpec((s_pad, e_pad), lambda t: (0, 0),
                                       pipeline_mode=pl.Buffered(1))],
                out_specs=pl.BlockSpec((tile_tok_eff, e_pad), lambda t: (t, 0)),
                scratch_shapes=[pltpu.VMEM((tile_tok_eff, e_pad), jnp.float32)],
            ),
            compiler_params=pltpu.CompilerParams(
                dimension_semantics=("parallel",),
                vmem_limit_bytes=vmem_limit),
        )(ids2, emb_matrix)
        out_flat = out_pad[:n_tok]

    return out_flat[:, :E].reshape(bs, seq_len, E)


# ---------------------------------------------------------------------------
# Pure-JAX reference (follows the PyTorch code path literally) for sanity check
# ---------------------------------------------------------------------------
def _reference_forward(token_ids, weight, co_matrix, ln_weight, ln_bias,
                       embedding_dim, order=3, eps=1e-5):
    rank = weight.shape[0]
    num_surfaces = co_matrix.shape[0]
    word = weight[:, co_matrix[:, 0], :]                     # (rank, S, cd)
    for i in range(1, order):
        w_ = weight[:, co_matrix[:, i], :]
        word = word[:, :, :, None] * w_[:, :, None, :]
        word = word.reshape(rank, num_surfaces, -1)
    word = word.sum(0)[:, :embedding_dim]
    mean = word.mean(-1, keepdims=True)
    var = ((word - mean) ** 2).mean(-1, keepdims=True)
    word = (word - mean) / jnp.sqrt(var + eps) * ln_weight + ln_bias
    return word[token_ids]


if __name__ == "__main__":
    # small, module-consistent shapes
    num_embeddings = 16      # morpheme vocabulary
    num_surfaces = 32        # surface (word) vocabulary
    embedding_dim = 32
    rank = 4
    order = 3
    core_dim = math.ceil(embedding_dim ** (1.0 / order))     # 4 (4**3 = 64 > 32 -> truncated)
    batch, seq = 2, 8

    key = jax.random.PRNGKey(0)
    k_w, k_co, k_ids = jax.random.split(key, 3)

    # xavier_uniform on (rank, num_embeddings, core_dim); row 0 of the vocab axis zeroed
    fan_in = num_embeddings * core_dim
    fan_out = rank * core_dim
    bound = math.sqrt(6.0 / (fan_in + fan_out))
    weight = jax.random.uniform(k_w, (rank, num_embeddings, core_dim),
                                dtype=jnp.float32, minval=-bound, maxval=bound)
    weight = weight.at[:, 0, :].set(0.0)

    co_matrix = jax.random.randint(k_co, (num_surfaces, order), 0, num_embeddings,
                                   dtype=jnp.int32)
    ln_weight = jnp.ones((embedding_dim,), jnp.float32)
    ln_bias = jnp.zeros((embedding_dim,), jnp.float32)
    token_ids = jax.random.randint(k_ids, (batch, seq), 0, num_surfaces, dtype=jnp.int32)

    # resident one-hot path (default choice for this tiny vocabulary)
    out_dense = morphte_embedding_forward(token_ids, weight, co_matrix, ln_weight,
                                          ln_bias, embedding_dim, order=order,
                                          force_gather=False)
    out_dense = jax.block_until_ready(out_dense)
    # large-vocab row-gather path (forced here to exercise it)
    out_gather = morphte_embedding_forward(token_ids, weight, co_matrix, ln_weight,
                                           ln_bias, embedding_dim, order=order,
                                           force_gather=True)
    out_gather = jax.block_until_ready(out_gather)

    ref = _reference_forward(token_ids, weight, co_matrix, ln_weight, ln_bias,
                             embedding_dim, order=order)

    assert out_dense.shape == (batch, seq, embedding_dim)
    assert out_gather.shape == (batch, seq, embedding_dim)
    od = jnp.asarray(out_dense, jnp.float32)
    og = jnp.asarray(out_gather, jnp.float32)
    # bf16 cores / bf16 matrix storage / bf16 output vs the f32 reference
    assert jnp.allclose(od, ref, atol=7.5e-2, rtol=5e-2), "one-hot path mismatch vs reference"
    assert jnp.allclose(og, ref, atol=7.5e-2, rtol=5e-2), "gather path mismatch vs reference"
    # both lookup paths read the same bf16 matrix -> must agree (near-)exactly
    assert jnp.allclose(od, og, atol=1e-5, rtol=0.0), "lookup paths disagree"

    print("KERNEL_OK")
</pallas_src>

<mosaic_0001>
module attributes {stable_mosaic.version = 11 : i64} {
  func.func @_emb_matrix_kernel(%arg0: i32, %arg1: memref<4x32x4xbf16, #tpu.memory_space<vmem>>, %arg2: memref<4x32x4xbf16, #tpu.memory_space<vmem>>, %arg3: memref<4x32x4xbf16, #tpu.memory_space<vmem>>, %arg4: memref<4x128xbf16, #tpu.memory_space<vmem>>, %arg5: memref<4x128xbf16, #tpu.memory_space<vmem>>, %arg6: memref<4x128xbf16, #tpu.memory_space<vmem>>, %arg7: memref<1x128xf32, #tpu.memory_space<vmem>>, %arg8: memref<1x128xf32, #tpu.memory_space<vmem>>, %arg9: memref<32x128xbf16, #tpu.memory_space<vmem>>, %arg10: memref<32x128xf32, #tpu.memory_space<vmem>>) attributes {dimension_semantics = [#tpu.dimension_semantics<parallel>], iteration_bounds = array<i64: 1>, scalar_prefetch = 0 : i64, scratch_operands = 1 : i64, tpu.core_type = #tpu.core_type<tc>, window_params = [{transform_indices = @transform_0, window_bounds = array<i64: 4, 32, 4>}, {transform_indices = @transform_1, window_bounds = array<i64: 4, 32, 4>}, {transform_indices = @transform_2, window_bounds = array<i64: 4, 32, 4>}, {pipeline_mode = #tpu.pipeline_mode<synchronous>, transform_indices = @transform_3, window_bounds = array<i64: 4, 128>}, {pipeline_mode = #tpu.pipeline_mode<synchronous>, transform_indices = @transform_4, window_bounds = array<i64: 4, 128>}, {pipeline_mode = #tpu.pipeline_mode<synchronous>, transform_indices = @transform_5, window_bounds = array<i64: 4, 128>}, {pipeline_mode = #tpu.pipeline_mode<synchronous>, transform_indices = @transform_6, window_bounds = array<i64: 1, 128>}, {pipeline_mode = #tpu.pipeline_mode<synchronous>, transform_indices = @transform_7, window_bounds = array<i64: 1, 128>}, {transform_indices = @transform_8, window_bounds = array<i64: 32, 128>}]} {
    %c0 = arith.constant 0 : index
    %c0_0 = arith.constant 0 : index
    %c0_1 = arith.constant 0 : index
    %0 = vector.load %arg1[%c0, %c0_0, %c0_1] : memref<4x32x4xbf16, #tpu.memory_space<vmem>>, vector<4x32x4xbf16>
    %1 = vector.shape_cast %0 : vector<4x32x4xbf16> to vector<128x4xbf16>
    %c0_2 = arith.constant 0 : index
    %c0_3 = arith.constant 0 : index
    %2 = vector.load %arg4[%c0_2, %c0_3] : memref<4x128xbf16, #tpu.memory_space<vmem>>, vector<4x128xbf16>
    %cst = arith.constant dense<0.000000e+00> : vector<128x128xf32>
    %3 = tpu.matmul %1, %2, %cst {dimension_numbers = #tpu.dot_dimension_numbers<[1], [0], [0], [1], [0, 0, 1, 1], [], []>} : vector<128x4xbf16>, vector<4x128xbf16>, vector<128x128xf32> -> vector<128x128xf32>
    %c0_4 = arith.constant 0 : index
    %c0_5 = arith.constant 0 : index
    %c0_6 = arith.constant 0 : index
    %4 = vector.load %arg2[%c0_4, %c0_5, %c0_6] : memref<4x32x4xbf16, #tpu.memory_space<vmem>>, vector<4x32x4xbf16>
    %5 = vector.shape_cast %4 : vector<4x32x4xbf16> to vector<128x4xbf16>
    %c0_7 = arith.constant 0 : index
    %c0_8 = arith.constant 0 : index
    %6 = vector.load %arg5[%c0_7, %c0_8] : memref<4x128xbf16, #tpu.memory_space<vmem>>, vector<4x128xbf16>
    %cst_9 = arith.constant dense<0.000000e+00> : vector<128x128xf32>
    %7 = tpu.matmul %5, %6, %cst_9 {dimension_numbers = #tpu.dot_dimension_numbers<[1], [0], [0], [1], [0, 0, 1, 1], [], []>} : vector<128x4xbf16>, vector<4x128xbf16>, vector<128x128xf32> -> vector<128x128xf32>
    %8 = arith.mulf %3, %7 : vector<128x128xf32>
    %c0_10 = arith.constant 0 : index
    %c0_11 = arith.constant 0 : index
    %c0_12 = arith.constant 0 : index
    %9 = vector.load %arg3[%c0_10, %c0_11, %c0_12] : memref<4x32x4xbf16, #tpu.memory_space<vmem>>, vector<4x32x4xbf16>
    %10 = vector.shape_cast %9 : vector<4x32x4xbf16> to vector<128x4xbf16>
    %c0_13 = arith.constant 0 : index
    %c0_14 = arith.constant 0 : index
    %11 = vector.load %arg6[%c0_13, %c0_14] : memref<4x128xbf16, #tpu.memory_space<vmem>>, vector<4x128xbf16>
    %cst_15 = arith.constant dense<0.000000e+00> : vector<128x128xf32>
    %12 = tpu.matmul %10, %11, %cst_15 {dimension_numbers = #tpu.dot_dimension_numbers<[1], [0], [0], [1], [0, 0, 1, 1], [], []>} : vector<128x4xbf16>, vector<4x128xbf16>, vector<128x128xf32> -> vector<128x128xf32>
    %13 = arith.mulf %8, %12 : vector<128x128xf32>
    %14 = vector.extract_strided_slice %13 {offsets = [0, 0], sizes = [32, 128], strides = [1, 1]} : vector<128x128xf32> to vector<32x128xf32>
    %15 = vector.extract_strided_slice %13 {offsets = [32, 0], sizes = [32, 128], strides = [1, 1]} : vector<128x128xf32> to vector<32x128xf32>
    %16 = arith.addf %14, %15 : vector<32x128xf32>
    %17 = vector.extract_strided_slice %13 {offsets = [64, 0], sizes = [32, 128], strides = [1, 1]} : vector<128x128xf32> to vector<32x128xf32>
    %18 = arith.addf %16, %17 : vector<32x128xf32>
    %19 = vector.extract_strided_slice %13 {offsets = [96, 0], sizes = [32, 128], strides = [1, 1]} : vector<128x128xf32> to vector<32x128xf32>
    %20 = arith.addf %18, %19 : vector<32x128xf32>
    %c0_16 = arith.constant 0 : index
    %c0_17 = arith.constant 0 : index
    %21 = vector.load %arg10[%c0_16, %c0_17] : memref<32x128xf32, #tpu.memory_space<vmem>>, vector<32x128xf32>
    tpu.vector_store %arg10[%c0_16, %c0_17], %20 {strides = array<i32>} : memref<32x128xf32, #tpu.memory_space<vmem>>, vector<32x128xf32>,
    %c0_18 = arith.constant 0 : index
    %c0_19 = arith.constant 0 : index
    %22 = vector.load %arg10[%c0_18, %c0_19] : memref<32x128xf32, #tpu.memory_space<vmem>>, vector<32x128xf32>
    %cst_20 = arith.constant dense<0.000000e+00> : vector<32xf32>
    %23 = vector.multi_reduction <add>, %22, %cst_20 [1] : vector<32x128xf32> to vector<32xf32>
    %24 = vector.shape_cast %23 : vector<32xf32> to vector<32x1xf32>
    %cst_21 = arith.constant 3.125000e-02 : f32
    %25 = vector.broadcast %cst_21 : f32 to vector<32x1xf32>
    %26 = arith.mulf %24, %25 : vector<32x1xf32>
    %27 = tpu.iota {dimensions = array<i32: 1>} : vector<32x128xi32>
    %c32_i32 = arith.constant 32 : i32
    %28 = vector.broadcast %c32_i32 : i32 to vector<32x128xi32>
    %29 = arith.cmpi slt, %27, %28 : vector<32x128xi32>
    %30 = vector.broadcast %26 : vector<32x1xf32> to vector<32x128xf32>
    %31 = arith.subf %22, %30 : vector<32x128xf32>
    %cst_22 = arith.constant 0.000000e+00 : f32
    %32 = vector.broadcast %cst_22 : f32 to vector<32x128xf32>
    %33 = arith.select %29, %31, %32 : vector<32x128xi1>, vector<32x128xf32>
    %34 = arith.mulf %33, %33 : vector<32x128xf32>
    %cst_23 = arith.constant dense<0.000000e+00> : vector<32xf32>
    %35 = vector.multi_reduction <add>, %34, %cst_23 [1] : vector<32x128xf32> to vector<32xf32>
    %36 = vector.shape_cast %35 : vector<32xf32> to vector<32x1xf32>
    %cst_24 = arith.constant 3.125000e-02 : f32
    %37 = vector.broadcast %cst_24 : f32 to vector<32x1xf32>
    %38 = arith.mulf %36, %37 : vector<32x1xf32>
    %cst_25 = arith.constant 9.99999974E-6 : f32
    %39 = vector.broadcast %cst_25 : f32 to vector<32x1xf32>
    %40 = arith.addf %38, %39 : vector<32x1xf32>
    %41 = math.rsqrt %40 : vector<32x1xf32>
    %42 = vector.broadcast %41 : vector<32x1xf32> to vector<32x128xf32>
    %43 = arith.mulf %33, %42 : vector<32x128xf32>
    %c0_26 = arith.constant 0 : index
    %c0_27 = arith.constant 0 : index
    %44 = vector.load %arg7[%c0_26, %c0_27] : memref<1x128xf32, #tpu.memory_space<vmem>>, vector<1x128xf32>
    %45 = vector.broadcast %44 : vector<1x128xf32> to vector<32x128xf32>
    %46 = arith.mulf %43, %45 : vector<32x128xf32>
    %c0_28 = arith.constant 0 : index
    %c0_29 = arith.constant 0 : index
    %47 = vector.load %arg8[%c0_28, %c0_29] : memref<1x128xf32, #tpu.memory_space<vmem>>, vector<1x128xf32>
    %48 = vector.broadcast %47 : vector<1x128xf32> to vector<32x128xf32>
    %49 = arith.addf %46, %48 : vector<32x128xf32>
    %50 = arith.truncf %49 : vector<32x128xf32> to vector<32x128xbf16>
    %c0_30 = arith.constant 0 : index
    %c0_31 = arith.constant 0 : index
    %51 = vector.load %arg9[%c0_30, %c0_31] : memref<32x128xbf16, #tpu.memory_space<vmem>>, vector<32x128xbf16>
    tpu.vector_store %arg9[%c0_30, %c0_31], %50 {strides = array<i32>} : memref<32x128xbf16, #tpu.memory_space<vmem>>, vector<32x128xbf16>,
    return
  }
  func.func @transform_0(%arg0: i32) -> (i32, i32, i32) {
    %c0_i32 = arith.constant 0 : i32
    %c0_i32_0 = arith.constant 0 : i32
    %c0_i32_1 = arith.constant 0 : i32
    return %c0_i32, %arg0, %c0_i32_0 : i32, i32, i32
  }
  func.func @transform_1(%arg0: i32) -> (i32, i32, i32) {
    %c0_i32 = arith.constant 0 : i32
    %c0_i32_0 = arith.constant 0 : i32
    %c0_i32_1 = arith.constant 0 : i32
    return %c0_i32, %arg0, %c0_i32_0 : i32, i32, i32
  }
  func.func @transform_2(%arg0: i32) -> (i32, i32, i32) {
    %c0_i32 = arith.constant 0 : i32
    %c0_i32_0 = arith.constant 0 : i32
    %c0_i32_1 = arith.constant 0 : i32
    return %c0_i32, %arg0, %c0_i32_0 : i32, i32, i32
  }
  func.func @transform_3(%arg0: i32) -> (i32, i32) {
    %c0_i32 = arith.constant 0 : i32
    %c0_i32_0 = arith.constant 0 : i32
    %c0_i32_1 = arith.constant 0 : i32
    return %c0_i32, %c0_i32_0 : i32, i32
  }
  func.func @transform_4(%arg0: i32) -> (i32, i32) {
    %c0_i32 = arith.constant 0 : i32
    %c0_i32_0 = arith.constant 0 : i32
    %c0_i32_1 = arith.constant 0 : i32
    return %c0_i32, %c0_i32_0 : i32, i32
  }
  func.func @transform_5(%arg0: i32) -> (i32, i32) {
    %c0_i32 = arith.constant 0 : i32
    %c0_i32_0 = arith.constant 0 : i32
    %c0_i32_1 = arith.constant 0 : i32
    return %c0_i32, %c0_i32_0 : i32, i32
  }
  func.func @transform_6(%arg0: i32) -> (i32, i32) {
    %c0_i32 = arith.constant 0 : i32
    %c0_i32_0 = arith.constant 0 : i32
    %c0_i32_1 = arith.constant 0 : i32
    return %c0_i32, %c0_i32_0 : i32, i32
  }
  func.func @transform_7(%arg0: i32) -> (i32, i32) {
    %c0_i32 = arith.constant 0 : i32
    %c0_i32_0 = arith.constant 0 : i32
    %c0_i32_1 = arith.constant 0 : i32
    return %c0_i32, %c0_i32_0 : i32, i32
  }
  func.func @transform_8(%arg0: i32) -> (i32, i32) {
    %c0_i32 = arith.constant 0 : i32
    %c0_i32_0 = arith.constant 0 : i32
    return %arg0, %c0_i32 : i32, i32
  }
}

</mosaic_0001>

<bundles_post_ra>
// kernel: tpu_custom_call.1
= control target key start
LH: loop header
LB: loop body
LE: loop exit
PB: predicated region body
PF: predicated region fallthrough
CT: control target
= control target key end

     0   :  { %vm113_vm0 = vcmask 1041408   ;;  %vm88_vm1 = vcmask 31744   ;;  %s1001_s0 = inlined_call_operand.vmem [shape: bf16[4,32,4], index: 0, kind: input, shape index: {}]   ;;  %s1002_s1 = inlined_call_operand.vmem [shape: bf16[4,32,4], index: 1, kind: input, shape index: {}]   ;;  %s1003_s2 = inlined_call_operand.vmem [shape: bf16[4,32,4], index: 2, kind: input, shape index: {}]   ;;  %s1004_s3 = inlined_call_operand.vmem [shape: bf16[4,128], index: 3, kind: input, shape index: {}]   ;;  %s1005_s4 = inlined_call_operand.vmem [shape: bf16[4,128], index: 4, kind: input, shape index: {}]   ;;  %s1006_s5 = inlined_call_operand.vmem [shape: bf16[4,128], index: 5, kind: input, shape index: {}]   ;;  %s1007_s6 = inlined_call_operand.vmem [shape: f32[1,128], index: 6, kind: input, shape index: {}]   ;;  %s1008_s7 = inlined_call_operand.vmem [shape: f32[1,128], index: 7, kind: input, shape index: {}]   ;;  %s1009_s8 = inlined_call_operand.hbm [shape: bf16[32,128], index: 8, kind: output, shape index: {}]  }
   0x1   :  { %v47_v0 = vld [vmem:[%s1004_s3] sm:$0x3]  ;;  %v739_v6 = vld [vmem:[%s1001_s0 + $0x30] sm:$0xff] }
   0x2   :  { %v182_v1 = vld [vmem:[%s1005_s4] sm:$0x3]  ;;  %v115_v2 = vsel %vm113_vm0, %v47_v0, 0 }
   0x3   :  { %v248_v3 = vsel %vm113_vm0, %v182_v1, 0  ;;  %v331_v4 = vld [vmem:[%s1006_s5] sm:$0x3]  ;;  %124 = vmatpush.bf16.msra.mxu0 %v115_v2  ;;  %768 = vmatpush.bf16.msra.mxu3 %v115_v2 }
   0x4   :  { %v733_v5 = vld [vmem:[%s1001_s0] sm:$0xff]  ;;  %v397_v7 = vsel %vm113_vm0, %v331_v4, 0  ;;  %257 = vmatpush.bf16.msra.mxu1 %v248_v3 }
   0x5   :  { %v741_v8 = vld [vmem:[%s1002_s1] sm:$0xff]  ;;  %406 = vmatpush.bf16.msra.mxu2 %v397_v7 }
   0x6   :  { %v749_v9 = vld [vmem:[%s1003_s2] sm:$0xff]  ;;  %645 = vmatmul.msk.bf16.vlgmr.msra.gmra.mxu0 %vm88_vm1, %v733_v5  ;;  %651 = vmatmul.msk.bf16.vlgmr.msra.gmra.mxu3 %vm88_vm1, %v739_v6 }
   0x7   :  { %769 = vmatpush.bf16.msrb.mxu3 %v248_v3  ;;  %685 = vmatmul.msk.bf16.vlgmr.msra.gmra.mxu1 %vm88_vm1, %v741_v8 }
   0x8   :  { %725 = vmatmul.msk.bf16.vlgmr.msra.gmra.mxu2 %vm88_vm1, %v749_v9 }
   0x9   :  { %13 = vsyncpa [#allocation4], 0  ;;  %v734_v10 = vld [vmem:[%s1001_s0 + $0x8] sm:$0xff]  ;;  %v740_v11 = vld [vmem:[%s1001_s0 + $0x38] sm:$0xff]  ;;  %s601_s12 = sshll.u32 %s1009_s8, 4  ;;  %s811_s13 = smov 64   ;;  %s602_s12 = int_to_ptr.hbm [resolvable:$true] %s601_s12 }
   0xa   :  { %v742_v12 = vld [vmem:[%s1002_s1 + $0x8] sm:$0xff]  ;;  %v735_v14 = vld [vmem:[%s1001_s0 + $0x10] sm:$0xff]  ;;  %v736_v18 = vld [vmem:[%s1001_s0 + $0x18] sm:$0xff]  ;;  %s812_s14 = smov 4  }
   0xb   :  { %770 = vmatpush.bf16.msra.mxu3 %v397_v7  ;;  %v750_v13 = vld [vmem:[%s1003_s2 + $0x8] sm:$0xff]  ;;  %v747_v15 = vld [vmem:[%s1002_s1 + $0x30] sm:$0xff]  ;;  %v748_v19 = vld [vmem:[%s1002_s1 + $0x38] sm:$0xff] }
   0xc   :  { %v743_v16 = vld [vmem:[%s1002_s1 + $0x10] sm:$0xff]  ;;  %v744_v20 = vld [vmem:[%s1002_s1 + $0x18] sm:$0xff]  ;;  %v737_v22 = vld [vmem:[%s1001_s0 + $0x20] sm:$0xff] }
   0xd   :  { %v751_v17 = vld [vmem:[%s1003_s2 + $0x10] sm:$0xff]  ;;  %v752_v21 = vld [vmem:[%s1003_s2 + $0x18] sm:$0xff]  ;;  %v745_v24 = vld [vmem:[%s1002_s1 + $0x20] sm:$0xff] }
   0xe   :  { %v755_v23 = vld [vmem:[%s1003_s2 + $0x30] sm:$0xff]  ;;  %v753_v25 = vld [vmem:[%s1003_s2 + $0x20] sm:$0xff]  ;;  %v738_v26 = vld [vmem:[%s1001_s0 + $0x28] sm:$0xff] }
   0xf   :  { %v756_v27 = vld [vmem:[%s1003_s2 + $0x38] sm:$0xff]  ;;  %v746_v28 = vld [vmem:[%s1002_s1 + $0x28] sm:$0xff] }
  0x10   :  { %v754_v29 = vld [vmem:[%s1003_s2 + $0x28] sm:$0xff] }
  0x16   :  { %646 = vmatmul.msk.bf16.gmra.mxu0 %vm88_vm1, %v734_v10  ;;  %652 = vmatmul.msk.bf16.gmra.mxu3 %vm88_vm1, %v740_v11 }
  0x17   :  { %686 = vmatmul.msk.bf16.gmra.mxu1 %vm88_vm1, %v742_v12 }
  0x18   :  { %726 = vmatmul.msk.bf16.gmra.mxu2 %vm88_vm1, %v750_v13 }
  0x26   :  { %647 = vmatmul.msk.bf16.gmra.mxu0 %vm88_vm1, %v735_v14  ;;  %691 = vmatmul.msk.bf16.vlgmr.msrb.gmra.mxu3 %vm88_vm1, %v747_v15 }
  0x27   :  { %687 = vmatmul.msk.bf16.gmra.mxu1 %vm88_vm1, %v743_v16 }
  0x28   :  { %727 = vmatmul.msk.bf16.gmra.mxu2 %vm88_vm1, %v751_v17 }
  0x36   :  { %648 = vmatmul.msk.bf16.gmra.mxu0 %vm88_vm1, %v736_v18  ;;  %692 = vmatmul.msk.bf16.gmra.mxu3 %vm88_vm1, %v748_v19 }
  0x37   :  { %688 = vmatmul.msk.bf16.gmra.mxu1 %vm88_vm1, %v744_v20 }
  0x38   :  { %728 = vmatmul.msk.bf16.gmra.mxu2 %vm88_vm1, %v752_v21 }
  0x46   :  { %649 = vmatmul.msk.bf16.gmra.mxu0 %vm88_vm1, %v737_v22  ;;  %731 = vmatmul.msk.bf16.vlgmr.msra.gmra.mxu3 %vm88_vm1, %v755_v23 }
  0x47   :  { %689 = vmatmul.msk.bf16.gmra.mxu1 %vm88_vm1, %v745_v24 }
  0x48   :  { %729 = vmatmul.msk.bf16.gmra.mxu2 %vm88_vm1, %v753_v25 }
  0x56   :  { %650 = vmatmul.msk.bf16.gmra.mxu0 %vm88_vm1, %v738_v26  ;;  %732 = vmatmul.msk.bf16.gmra.mxu3 %vm88_vm1, %v756_v27 }
  0x57   :  { %690 = vmatmul.msk.bf16.gmra.mxu1 %vm88_vm1, %v746_v28 }
  0x58   :  { %730 = vmatmul.msk.bf16.gmra.mxu2 %vm88_vm1, %v754_v29 }
  0x83   :  { %v126_v30 = vpop.f32.mrf.mxu0 }
  0x84   :  { %v259_v31 = vpop.f32.mrf.mxu1 }
  0x85   :  { %v299_v1 = vmul.f32 %v259_v31, %v126_v30 }
  0x89   :  { %v156_v32 = vpop.f32.mrf.mxu3 }
  0x8b   :  { %v408_v33 = vpop.f32.mrf.mxu2  ;;  %v128_v34 = vpop.f32.mrf.mxu0 }
  0x8c   :  { %v261_v35 = vpop.f32.mrf.mxu1  ;;  %v448_v4 = vmul.f32 %v408_v33, %v299_v1 }
  0x8d   :  { %v300_v15 = vmul.f32 %v261_v35, %v128_v34 }
  0x91   :  { %v158_v36 = vpop.f32.mrf.mxu3 }
  0x93   :  { %v410_v37 = vpop.f32.mrf.mxu2  ;;  %v131_v38 = vpop.f32.mrf.mxu0 }
  0x94   :  { %v264_v39 = vpop.f32.mrf.mxu1  ;;  %v449_v18 = vmul.f32 %v410_v37, %v300_v15 }
  0x95   :  { %v301_v28 = vmul.f32 %v264_v39, %v131_v38 }
  0x99   :  { %v963_v40 = vpop.f32.mrf.mxu3 }
  0x9b   :  { %v413_v41 = vpop.f32.mrf.mxu2  ;;  %v965_v42 = vpop.f32.mrf.mxu0 }
  0x9c   :  { %v967_v43 = vpop.f32.mrf.mxu1  ;;  %v450_v34 = vmul.f32 %v413_v41, %v301_v28 }
  0x9d   :  { %v302_v38 = vmul.f32 %v967_v43, %v965_v42 }
  0xa1   :  { %v969_v44 = vpop.f32.mrf.mxu3 }
  0xa3   :  { %v971_v45 = vpop.f32.mrf.mxu2  ;;  %v136_v46 = vpop.f32.mrf.mxu0 }
  0xa4   :  { %v269_v47 = vpop.f32.mrf.mxu1 }
  0xa5   :  { %v303_v62 = vmul.f32 %v269_v47, %v136_v46 }
  0xa9   :  { %v289_v48 = vpop.f32.mrf.mxu3 }
  0xaa   :  { %v311_v7 = vmul.f32 %v289_v48, %v156_v32 }
  0xab   :  { %v418_v49 = vpop.f32.mrf.mxu2  ;;  %v138_v50 = vpop.f32.mrf.mxu0 }
  0xac   :  { %v271_v51 = vpop.f32.mrf.mxu1  ;;  %v452_v2 = vmul.f32 %v418_v49, %v303_v62 }
  0xad   :  { %v304_v12 = vmul.f32 %v271_v51, %v138_v50 }
  0xae   :  { %v464_v8 = vadd.f32 %v452_v2, %v448_v4 }
  0xb1   :  { %v291_v52 = vpop.f32.mrf.mxu3 }
  0xb2   :  { %v312_v22 = vmul.f32 %v291_v52, %v158_v36 }
  0xb3   :  { %v420_v53 = vpop.f32.mrf.mxu2  ;;  %v141_v54 = vpop.f32.mrf.mxu0 }
  0xb4   :  { %v274_v55 = vpop.f32.mrf.mxu1  ;;  %v453_v16 = vmul.f32 %v420_v53, %v304_v12 }
  0xb5   :  { %v305_v24 = vmul.f32 %v274_v55, %v141_v54  ;;  %v451_v54 = vmul.f32 %v971_v45, %v302_v38 }
  0xb6   :  { %v465_v23 = vadd.f32 %v453_v16, %v449_v18 }
  0xb9   :  { %v294_v56 = vpop.f32.mrf.mxu3 }
  0xba   :  { %v313_v46 = vmul.f32 %v294_v56, %v963_v40 }
  0xbb   :  { %v423_v57 = vpop.f32.mrf.mxu2  ;;  %v143_v58 = vpop.f32.mrf.mxu0 }
  0xbc   :  { %v276_v59 = vpop.f32.mrf.mxu1  ;;  %v454_v31 = vmul.f32 %v423_v57, %v305_v24 }
  0xbd   :  { %v306_v36 = vmul.f32 %v276_v59, %v143_v58 }
  0xbe   :  { %v466_v47 = vadd.f32 %v454_v31, %v450_v34 }
  0xc1   :  { %v296_v60 = vpop.f32.mrf.mxu3 }
  0xc2   :  { %v314_v40 = vmul.f32 %v296_v60, %v969_v44 }
  0xc3   :  { %v425_v61 = vpop.f32.mrf.mxu2  ;;  %v146_v63 = vpop.f32.mrf.mxu0 }
  0xc4   :  { %v279_v0 = vpop.f32.mrf.mxu1  ;;  %v455_v39 = vmul.f32 %v425_v61, %v306_v36  ;;  %v774_v36 = vld [vmem:[%s1007_s6] ss:$0 sm:$0xff]  ;;  %s810_s6 = smov [#allocation3]  }
  0xc5   :  { %v307_v3 = vmul.f32 %v279_v0, %v146_v63  ;;  %v496_v0 = vlaneseq }
  0xc6   :  { %v467_v56 = vadd.f32 %v455_v39, %v451_v54 }
  0xc7   :  { %v497_v1 = vand.u32 127, %v496_v0 }
  0xc9   :  { %v438_v5 = vpop.f32.mrf.mxu3  ;;  %vm498_vm2 = vcmp.lt.s32.totalorder %v497_v1, 32 }
  0xca   :  { %v460_v14 = vmul.f32 %v438_v5, %v311_v7 }
  0xcb   :  { %v428_v6 = vpop.f32.mrf.mxu2  ;;  %v148_v10 = vpop.f32.mrf.mxu0 }
  0xcc   :  { %v456_v9 = vmul.f32 %v428_v6, %v307_v3  ;;  %v281_v11 = vpop.f32.mrf.mxu1 }
  0xcd   :  { %v308_v19 = vmul.f32 %v281_v11, %v148_v10 }
  0xce   :  { %v468_v13 = vadd.f32 %v464_v8, %v456_v9 }
  0xd0   :  { %v472_v17 = vadd.f32 %v468_v13, %v460_v14 }
  0xd1   :  { %v440_v20 = vpop.f32.mrf.mxu3 }
  0xd2   :  { %484 = vadd.xlane.f32.xlu0 %v472_v17  ;;  %v461_v30 = vmul.f32 %v440_v20, %v312_v22 }
  0xd3   :  { %v430_v21 = vpop.f32.mrf.mxu2  ;;  %v151_v26 = vpop.f32.mrf.mxu0 }
  0xd4   :  { %v457_v25 = vmul.f32 %v430_v21, %v308_v19  ;;  %v284_v27 = vpop.f32.mrf.mxu1 }
  0xd5   :  { %v309_v32 = vmul.f32 %v284_v27, %v151_v26 }
  0xd6   :  { %v469_v29 = vadd.f32 %v465_v23, %v457_v25 }
  0xd8   :  { %v473_v33 = vadd.f32 %v469_v29, %v461_v30 }
  0xd9   :  { %v443_v35 = vpop.f32.mrf.mxu3 }
  0xda   :  { %486 = vadd.xlane.f32.xlu0 %v473_v33  ;;  %v462_v50 = vmul.f32 %v443_v35, %v313_v46 }
  0xdb   :  { %v433_v37 = vpop.f32.mrf.mxu2  ;;  %v153_v51 = vpop.f32.mrf.mxu0 }
  0xdc   :  { %v458_v48 = vmul.f32 %v433_v37, %v309_v32  ;;  %v286_v52 = vpop.f32.mrf.mxu1 }
  0xdd   :  { %v310_v41 = vmul.f32 %v286_v52, %v153_v51 }
  0xde   :  { %v470_v49 = vadd.f32 %v466_v47, %v458_v48 }
  0xe0   :  { %v474_v53 = vadd.f32 %v470_v49, %v462_v50 }
  0xe1   :  { %v445_v57 = vpop.f32.mrf.mxu3 }
  0xe2   :  { %488 = vadd.xlane.f32.xlu1 %v474_v53  ;;  %v463_v59 = vmul.f32 %v445_v57, %v314_v40 }
  0xe3   :  { %v435_v55 = vpop.f32.mrf.mxu2 }
  0xe4   :  { %v459_v62 = vmul.f32 %v435_v55, %v310_v41 }
  0xe6   :  { %v471_v58 = vadd.f32 %v467_v56, %v459_v62 }
  0xe8   :  { %v475_v63 = vadd.f32 %v471_v58, %v463_v59 }
  0xea   :  { %490 = vadd.xlane.f32.xlu1 %v475_v63 }
 0x145   :  { %v485_v2 = vpop.xlane.xlu0 %484 }
 0x146   :  { %v492_v42 = vmul.f32 0.03125, %v485_v2 }
 0x148   :  { %v499_v43 = vsub.f32 %v472_v17, %v492_v42 }
 0x14a   :  { %v503_v45 = vsel %vm498_vm2, %v499_v43, 0.0 }
 0x14b   :  { %v507_v61 = vmul.f32 %v503_v45, %v503_v45 }
 0x14d   :  { %511 = vadd.xlane.f32.xlu2 %v507_v61  ;;  %v487_v3 = vpop.xlane.xlu0 %486 }
 0x14e   :  { %v493_v4 = vmul.f32 0.03125, %v487_v3 }
 0x150   :  { %v500_v5 = vsub.f32 %v473_v33, %v493_v4 }
 0x152   :  { %v504_v44 = vsel %vm498_vm2, %v500_v5, 0.0 }
 0x153   :  { %v508_v60 = vmul.f32 %v504_v44, %v504_v44 }
 0x155   :  { %513 = vadd.xlane.f32.xlu2 %v508_v60  ;;  %v489_v6 = vpop.xlane.xlu1 %488 }
 0x156   :  { %v494_v7 = vmul.f32 0.03125, %v489_v6 }
 0x158   :  { %v501_v8 = vsub.f32 %v474_v53, %v494_v7  ;;  %v775_v53 = vld [vmem:[%s1008_s7] ss:$0 sm:$0xff]  ;;  %s599_s7 = sshll.u32 %s810_s6, 4  ;;  %s600_s7 = int_to_ptr.vmem [resolvable:$true] %s599_s7 }
 0x15a   :  { %v981_v9 = vsel %vm498_vm2, %v501_v8, 0.0 }
 0x15b   :  { %v509_v10 = vmul.f32 %v981_v9, %v981_v9 }
 0x15d   :  { %515 = vadd.xlane.f32.xlu0 %v509_v10  ;;  %v491_v11 = vpop.xlane.xlu1 %490 }
 0x15e   :  { %v495_v12 = vmul.f32 0.03125, %v491_v11 }
 0x160   :  { %v502_v13 = vsub.f32 %v475_v63, %v495_v12 }
 0x162   :  { %v986_v14 = vsel %vm498_vm2, %v502_v13, 0.0 }
 0x163   :  { %v510_v15 = vmul.f32 %v986_v14, %v986_v14 }
 0x165   :  { %517 = vadd.xlane.f32.xlu1 %v510_v15 }
 0x1c0   :  { %v512_v16 = vpop.xlane.xlu2 %511 }
 0x1c1   :  { %v519_v17 = vmul.f32 0.03125, %v512_v16 }
 0x1c3   :  { %v523_v18 = vadd.f32 1e-05, %v519_v17 }
 0x1c5   :  { %776 = vrsqrt.f32 %v523_v18  ;;  %vm533_vm4 = vweird.f32 %v523_v18 }
 0x1c8   :  { %v514_v19 = vpop.xlane.xlu2 %513 }
 0x1c9   :  { %v520_v20 = vmul.f32 0.03125, %v514_v19 }
 0x1cb   :  { %v777_v21 = vpop.eup %776  ;;  %v524_v22 = vadd.f32 1e-05, %v520_v20 }
 0x1cc   :  { %v528_v23 = vmul.f32 %v777_v21, %v523_v18  ;;  %vm534_vm3 = vweird.f32 %v777_v21 }
 0x1cd   :  { %778 = vrsqrt.f32 %v524_v22  ;;  %vm535_vm5 = vmor %vm533_vm4, %vm534_vm3  ;;  %vm543_vm7 = vweird.f32 %v524_v22 }
 0x1ce   :  { %v529_v24 = vmul.f32 %v777_v21, %v528_v23 }
 0x1d0   :  { %v530_v25 = vmul.f32 0.5, %v529_v24  ;;  %v516_v26 = vpop.xlane.xlu0 %515 }
 0x1d1   :  { %v521_v27 = vmul.f32 0.03125, %v516_v26 }
 0x1d2   :  { %v531_v28 = vsub.f32 1.5, %v530_v25 }
 0x1d3   :  { %v779_v29 = vpop.eup %778  ;;  %v525_v30 = vadd.f32 1e-05, %v521_v27 }
 0x1d4   :  { %v532_v31 = vmul.f32 %v777_v21, %v531_v28  ;;  %v538_v32 = vmul.f32 %v779_v29, %v524_v22  ;;  %vm544_vm6 = vweird.f32 %v779_v29 }
 0x1d5   :  { %780 = vrsqrt.f32 %v525_v30  ;;  %vm545_vm8 = vmor %vm543_vm7, %vm544_vm6  ;;  %vm553_vm10 = vweird.f32 %v525_v30 }
 0x1d6   :  { %v539_v33 = vmul.f32 %v779_v29, %v538_v32  ;;  %v536_v34 = vsel %vm535_vm5, %v777_v21, %v532_v31 }
 0x1d7   :  { %v567_v49 = vmul.f32 %v536_v34, %v503_v45 }
 0x1d8   :  { %v540_v35 = vmul.f32 0.5, %v539_v33  ;;  %v518_v37 = vpop.xlane.xlu1 %517 }
 0x1d9   :  { %v522_v46 = vmul.f32 0.03125, %v518_v37  ;;  %v575_v54 = vmul.f32 %v774_v36, %v567_v49 }
 0x1da   :  { %v541_v47 = vsub.f32 1.5, %v540_v35 }
 0x1db   :  { %v781_v48 = vpop.eup %780  ;;  %v526_v50 = vadd.f32 1e-05, %v522_v46  ;;  %v583_v62 = vadd.f32 %v775_v53, %v575_v54 }
 0x1dc   :  { %v542_v51 = vmul.f32 %v779_v29, %v541_v47  ;;  %v548_v52 = vmul.f32 %v781_v48, %v525_v30  ;;  %vm554_vm9 = vweird.f32 %v781_v48 }
 0x1dd   :  { %782 = vrsqrt.f32 %v526_v50  ;;  %vm555_vm11 = vmor %vm553_vm10, %vm554_vm9  ;;  %vm563_vm13 = vweird.f32 %v526_v50 }
 0x1de   :  { %v546_v38 = vsel %vm545_vm8, %v779_v29, %v542_v51  ;;  %v549_v39 = vmul.f32 %v781_v48, %v548_v52 }
 0x1df   :  { %v568_v41 = vmul.f32 %v546_v38, %v504_v44 }
 0x1e0   :  { %v550_v55 = vmul.f32 0.5, %v549_v39 }
 0x1e1   :  { %v576_v57 = vmul.f32 %v774_v36, %v568_v41 }
 0x1e2   :  { %v551_v40 = vsub.f32 1.5, %v550_v55 }
 0x1e3   :  { %v783_v56 = vpop.eup %782  ;;  %v584_v58 = vadd.f32 %v775_v53, %v576_v57 }
 0x1e4   :  { %v552_v59 = vmul.f32 %v781_v48, %v551_v40  ;;  %v558_v63 = vmul.f32 %v783_v56, %v526_v50  ;;  %vm564_vm12 = vweird.f32 %v783_v56 }
 0x1e5   :  { %v760_v0 = vpack.c.bf16 %v584_v58, %v583_v62  ;;  %vm565_vm14 = vmor %vm563_vm13, %vm564_vm12 }
 0x1e6   :  { %v559_v1 = vmul.f32 %v783_v56, %v558_v63  ;;  %v556_v2 = vsel %vm555_vm11, %v781_v48, %v552_v59 }
 0x1e7   :  { %761 = vst [vmem:[#allocation3] sm:$0xff] %v760_v0   ;;  %v569_v45 = vmul.f32 %v556_v2, %v981_v9 }
 0x1e8   :  { %v560_v42 = vmul.f32 0.5, %v559_v1 }
 0x1e9   :  { %v577_v4 = vmul.f32 %v774_v36, %v569_v45 }
 0x1ea   :  { %v561_v43 = vsub.f32 1.5, %v560_v42 }
 0x1eb   :  { %v585_v60 = vadd.f32 %v775_v53, %v577_v4 }
 0x1ec   :  { %v562_v61 = vmul.f32 %v783_v56, %v561_v43 }
 0x1ee   :  { %v566_v3 = vsel %vm565_vm14, %v783_v56, %v562_v61 }
 0x1ef   :  { %v570_v5 = vmul.f32 %v566_v3, %v986_v14 }
 0x1f1   :  { %v578_v44 = vmul.f32 %v774_v36, %v570_v5 }
 0x1f3   :  { %v586_v6 = vadd.f32 %v775_v53, %v578_v44 }
 0x1f5   :  { %v765_v7 = vpack.c.bf16 %v586_v6, %v585_v60 }
 0x1f7   :  { %767 = vst [vmem:[#allocation3 + $0x8] sm:$0xff] %v765_v7  }
 0x1f8   :  { %607 = dma.vmem_to_hbm [thread:$0]  %s600_s7, 256, %s602_s12, [#allocation4], %s811_s13, %s811_s13, %s812_s14  }
 0x1f9   :  { %808 = dma.done.wait [#allocation4], 256  }
 0x1fa   :  { %809 = vsyncadd [#allocation4], 4294967040 }
 0x1fb   :  { %612 = vsyncpa [#allocation4], 1 }

</bundles_post_ra>
